<compile_context>
chip_gen: v5e
topology: v5e:2x2
jax: 0.10.0
libtpu: 0.0.40
codegen_flags: <defaults>
</compile_context>

<pallas_src>
import functools
import math

import jax
import jax.numpy as jnp
from jax.experimental import pallas as pl
from jax.experimental.pallas import tpu as pltpu


# ---------------------------------------------------------------------------
# Kernels (HBM-bandwidth-bound broadcast-add, optionally fused dropout)
# ---------------------------------------------------------------------------
def _ppe_add_kernel(x_ref, enc_ref, o_ref):
    # x_ref: (bt, ct); enc_ref: (1, ct) or (bt, ct)  -> plain / broadcast add.
    o_ref[...] = (x_ref[...] + enc_ref[...]).astype(o_ref.dtype)


def _ppe_add_dropout_kernel(seed_ref, x_ref, enc_ref, o_ref, *, p):
    if p >= 1.0:                       # trace-time constant: everything dropped
        o_ref[...] = jnp.zeros(o_ref.shape, o_ref.dtype)
        return

    y = x_ref[...] + enc_ref[...]

    # Distinct PRNG stream per grid tile (fold both grid axes into the seed).
    # NOTE: the realized mask depends on the tile shape (not reproducible
    # across tilings) and reusing the same host `seed` across calls reuses the
    # same mask -- acceptable for dropout.
    pltpu.prng_seed(seed_ref[0]
                    + pl.program_id(0) * pl.num_programs(1)
                    + pl.program_id(1))
    bits = pltpu.bitcast(pltpu.prng_random_bits(y.shape), jnp.uint32)
    # keep with prob (1 - p); threshold rounding bias is <= 2**-32 and for
    # extremely small p (threshold rounds to 0) nothing is dropped.
    threshold = jnp.uint32(min(int(p * (2 ** 32)), 2 ** 32 - 1))
    keep = bits >= threshold
    y = jnp.where(keep, y * (1.0 / (1.0 - p)), jnp.zeros_like(y))
    o_ref[...] = y.astype(o_ref.dtype)


# ---------------------------------------------------------------------------
# Buffer construction — deterministic, mirrors the PyTorch __init__
# ---------------------------------------------------------------------------
def make_encoding(d_model, period=25, max_seq_len=600, dtype=jnp.float32):
    position = jnp.arange(period, dtype=jnp.float32)[:, None]              # (period, 1)
    inside = jnp.exp(jnp.arange(0, d_model, 2, dtype=jnp.float32)
                     * (-math.log(10000.0) / d_model))                     # (d_model/2,)
    angles = position * inside                                             # (period, d_model/2)
    enc = jnp.zeros((period, d_model), dtype=jnp.float32)
    enc = enc.at[:, 0::2].set(jnp.sin(angles))
    enc = enc.at[:, 1::2].set(jnp.cos(angles))
    enc = enc[None, :, :]                                                  # (1, period, d_model)
    enc = jnp.tile(enc, (1, max_seq_len // period + 1, 1))                 # (1, L, d_model)
    return enc.astype(dtype)


# ---------------------------------------------------------------------------
# Hardware-aware budgets & tiling
# ---------------------------------------------------------------------------
def _vmem_budget():
    """Generation-aware block / VMEM budget.

    v7x   : 64 MiB VMEM  -> ~48 MiB limit, ~8 MiB blocks.
    v5e/v6e: 128 MiB VMEM -> ~96 MiB limit, 16 MiB blocks.
    """
    vmem_cap = 0
    try:
        info = pltpu.get_tpu_info()
        for name in ("vmem_capacity_bytes", "vmem_bytes", "vmem_size_bytes"):
            v = getattr(info, name, None)
            if v:
                vmem_cap = int(v)
                break
    except Exception:
        vmem_cap = 0
    if not vmem_cap:
        vmem_cap = 64 << 20            # conservative fallback (v7x per-core VMEM)
    vmem_limit_cap = (3 * vmem_cap) // 4
    # double-buffered input + output = 4x block, plus encoding + headroom
    block_target = min(16 << 20, max(2 << 20, (vmem_limit_cap - (4 << 20)) // 5))
    return block_target, vmem_limit_cap


def _sublane_min(itemsize):
    # Native f32 tile is (8, 128); sub-32-bit dtypes pack along sublanes so a
    # full packed tile needs proportionally more rows (bf16: 16, int8/fp8: 32).
    return max(8, (8 * 4) // max(1, int(itemsize)))


def _choose_row_split(B, T, D, itemsize):
    """Pick Ts (divisor of T) so x can be viewed as (B*Ts, (T//Ts)*D).

    * B >= native sublane rows -> Ts = 1 (already sublane-dense).
    * otherwise: the smallest multiple-of-8 divisor Ts of T that keeps the lane
      dim (T//Ts)*D a multiple of 128.  The row block then equals Ts and the
      encoding slab becomes (Ts, (T//Ts)*D): every block is a same-shape add on
      full vregs with unmasked stores.
    * no such divisor -> Ts = 1 (tiny / oddly shaped inputs).
    """
    sub_min = _sublane_min(itemsize)
    if B >= sub_min:
        return 1
    candidates = [t for t in range(8, T + 1, 8)
                  if T % t == 0 and ((T // t) * D) % 128 == 0]
    if not candidates:
        return 1
    for t in candidates:               # prefer a full packed tile for the dtype
        if t % sub_min == 0:
            return t
    return candidates[0]


def _choose_tiles(rows, cols, itemsize, ts, block_target):
    """Block sizes obeying the (8,128) rule, sized for pipelining.

    * >= ~8 grid steps whenever the slab exceeds ~1 MiB, so the DMA pipeline
      can overlap in/compute/out and v7x can shard the grid across its 2 TCs.
    * lane (column) tile: widest multiple of 128 fitting the block budget.
    * sublane (row) tile: dtype-aware multiple (8 f32 / 16 bf16 / 32 int8), or
      the fixed encoding period Ts when the small-batch row split is active.
    """
    sub_min = _sublane_min(itemsize)
    total = rows * cols * itemsize
    if total > (1 << 20):
        block_target = max(min(block_target, total // 8),
                           sub_min * 128 * itemsize)

    row_hint = ts if ts > 1 else sub_min
    if cols % 128 == 0:
        ct = (block_target // (row_hint * itemsize)) // 128 * 128
        ct = int(min(max(ct, 128), cols))
    else:
        ct = cols                       # (8,128) rule: non-multiple -> full width

    if ts > 1:
        bt = ts                         # row block == encoding period
    else:
        cap = max(1, block_target // (ct * itemsize))
        if cap >= rows:
            bt = rows                   # whole row extent (small batch / slab)
        else:
            bt = (cap // sub_min) * sub_min
            if bt == 0:
                bt = min(sub_min, rows)
    return bt, ct


# ---------------------------------------------------------------------------
# Module wrapper (caches encoding slabs and built pallas_calls)
# ---------------------------------------------------------------------------
class PeriodicPositionalEncodingPallas:
    """Pallas-TPU port of PeriodicPositionalEncoding.forward."""

    def __init__(self, d_model, dropout=0.1, period=25, max_seq_len=600):
        self.d_model = int(d_model)
        self.p = float(dropout)
        self.encoding = make_encoding(d_model, period=period,
                                      max_seq_len=max_seq_len)    # (1, L, D) f32
        self._block_target, self._vmem_cap = _vmem_budget()
        self._enc_cache = {}      # (T, ts, dtype)      -> (ts, cols) slab
        self._call_cache = {}     # static tiling config -> pallas_call callable

    # -- cached encoding slab (slice/cast/reshape once, off the hot path) -----
    def _enc_slab(self, T, ts, dtype):
        key = (T, ts, jnp.dtype(dtype).name)
        enc = self._enc_cache.get(key)
        if enc is None:
            cols = (T // ts) * self.d_model
            enc = self.encoding[0, :T, :].astype(dtype).reshape(ts, cols)
            enc = jax.block_until_ready(enc)
            self._enc_cache[key] = enc
        return enc

    # -- cached pallas_call ----------------------------------------------------
    def _build_call(self, rows, cols, er, bt, ct, dtype, training, donate):
        n_rt = pl.cdiv(rows, bt)
        n_ct = pl.cdiv(cols, ct)

        # Column axis outermost whenever it is split: the encoding block index
        # (0, c) is then constant over the inner row axis, so Pallas skips the
        # redundant encoding DMA (fetched once per column tile).
        if n_ct > 1:
            grid = (n_ct, n_rt)
            if training:
                x_map = lambda c, r, s: (r, c)
                e_map = lambda c, r, s: (0, c)
            else:
                x_map = lambda c, r: (r, c)
                e_map = lambda c, r: (0, c)
        else:
            grid = (n_rt, n_ct)
            if training:
                x_map = lambda r, c, s: (r, c)
                e_map = lambda r, c, s: (0, c)
            else:
                x_map = lambda r, c: (r, c)
                e_map = lambda r, c: (0, c)

        itemsize = jnp.dtype(dtype).itemsize
        block_bytes = bt * ct * itemsize
        enc_bytes = er * ct * itemsize
        # double-buffered x in + out (4x block) + double-buffered enc + margin
        vmem_limit = int(min(self._vmem_cap,
                             max(8 << 20,
                                 4 * block_bytes + 2 * enc_bytes + (2 << 20))))
        compiler_params = pltpu.CompilerParams(
            dimension_semantics=("parallel", "parallel"),
            vmem_limit_bytes=vmem_limit)

        out_shape = jax.ShapeDtypeStruct((rows, cols), dtype)
        x_spec = pl.BlockSpec((bt, ct), x_map)
        e_spec = pl.BlockSpec((er, ct), e_map)
        o_spec = pl.BlockSpec((bt, ct), x_map)

        if not training:
            return pl.pallas_call(
                _ppe_add_kernel,
                out_shape=out_shape,
                grid=grid,
                in_specs=[x_spec, e_spec],
                out_specs=o_spec,
                compiler_params=compiler_params,
                input_output_aliases=({0: 0} if donate else {}),
            )

        kernel = functools.partial(_ppe_add_dropout_kernel, p=self.p)
        return pl.pallas_call(
            kernel,
            out_shape=out_shape,
            grid_spec=pltpu.PrefetchScalarGridSpec(
                num_scalar_prefetch=1,
                grid=grid,
                in_specs=[x_spec, e_spec],
                out_specs=o_spec),
            compiler_params=compiler_params,
            # input_output_aliases indexes the *flattened* operand list, which
            # includes the scalar-prefetch seed, so x is operand index 1.
            input_output_aliases=({1: 0} if donate else {}),
        )

    def __call__(self, x, *, training=False, seed=0, donate_x=False):
        B, T, D = x.shape
        assert D == self.d_model, "x feature dim must equal d_model"
        assert T <= self.encoding.shape[1], "sequence longer than encoding buffer"

        itemsize = jnp.dtype(x.dtype).itemsize
        ts = _choose_row_split(B, T, D, itemsize)
        rows, cols = B * ts, (T // ts) * D
        bt, ct = _choose_tiles(rows, cols, itemsize, ts, self._block_target)

        use_dropout = bool(training) and self.p > 0.0
        key = (rows, cols, ts, bt, ct, jnp.dtype(x.dtype).name,
               use_dropout, bool(donate_x))
        call = self._call_cache.get(key)
        if call is None:
            call = self._build_call(rows, cols, ts, bt, ct, x.dtype,
                                    use_dropout, bool(donate_x))
            self._call_cache[key] = call

        enc2 = self._enc_slab(T, ts, x.dtype)
        x2 = x.reshape(rows, cols)             # lane-dense slab view

        if use_dropout:
            # TODO(synk): training-mode dropout uses the TPU hardware PRNG; it
            # cannot bitwise-match torch.nn.Dropout's RNG stream.
            out2 = call(jnp.asarray([seed], dtype=jnp.int32), x2, enc2)
        else:
            out2 = call(x2, enc2)
        return out2.reshape(B, T, D)


# ---------------------------------------------------------------------------
# Demo / correctness check
# ---------------------------------------------------------------------------
if __name__ == "__main__":
    key = jax.random.PRNGKey(0)
    k1, k2, k3 = jax.random.split(key, 3)

    # Small shape matching the module (batch=2, seq=8, d_model=32), eval mode
    # (dropout is identity) -- matches PyTorch model.eval().
    B, T, D = 2, 8, 32
    x = jax.random.normal(k1, (B, T, D), dtype=jnp.float32)
    ppe = PeriodicPositionalEncodingPallas(D, dropout=0.1)
    out = jax.block_until_ready(ppe(x, training=False))
    ref = x + ppe.encoding[:, :T, :]
    assert out.shape == (B, T, D)
    assert jnp.allclose(out, ref, atol=1e-6), "mismatch (small case)"

    # Larger slab: exercises the multi-tile, column-outer pipelined grid.
    ppe256 = PeriodicPositionalEncodingPallas(256, dropout=0.1)
    xb = jax.random.normal(k2, (8, 600, 256), dtype=jnp.float32)
    outb = jax.block_until_ready(ppe256(xb, training=False))
    refb = xb + ppe256.encoding[:, :600, :]
    assert jnp.allclose(outb, refb, atol=1e-6), "mismatch (bandwidth case)"

    # Small batch: exercises the sublane row-split (B*Ts >= 8, lane dim % 128).
    xs = jax.random.normal(k3, (2, 600, 256), dtype=jnp.float32)
    outs = jax.block_until_ready(ppe256(xs, training=False))
    refs = xs + ppe256.encoding[:, :600, :]
    assert jnp.allclose(outs, refs, atol=1e-6), "mismatch (small-batch split case)"

    # Second call reuses the cached encoding slab and built pallas_call.
    out2 = jax.block_until_ready(ppe(x, training=False))
    assert jnp.allclose(out2, ref, atol=1e-6)

    # NOTE: training-mode dropout uses the TPU hardware PRNG (pltpu.prng_*),
    # which has no CPU/interpret lowering, so it is only exercised on real TPU
    # hardware and will not bitwise-match torch's dropout stream.
    print("KERNEL_OK")
</pallas_src>

<mosaic_0001>
module attributes {stable_mosaic.version = 11 : i64} {
  func.func @_ppe_add_kernel(%arg0: i32, %arg1: i32, %arg2: memref<2x256xf32, #tpu.memory_space<vmem>>, %arg3: memref<1x256xf32, #tpu.memory_space<vmem>>, %arg4: memref<2x256xf32, #tpu.memory_space<vmem>>) attributes {dimension_semantics = [#tpu.dimension_semantics<parallel>, #tpu.dimension_semantics<parallel>], iteration_bounds = array<i64: 1, 1>, scalar_prefetch = 0 : i64, scratch_operands = 0 : i64, tpu.core_type = #tpu.core_type<tc>, window_params = [{transform_indices = @transform_0, window_bounds = array<i64: 2, 256>}, {transform_indices = @transform_1, window_bounds = array<i64: 1, 256>}, {transform_indices = @transform_2, window_bounds = array<i64: 2, 256>}]} {
    %c0 = arith.constant 0 : index
    %c0_0 = arith.constant 0 : index
    %0 = vector.load %arg2[%c0, %c0_0] : memref<2x256xf32, #tpu.memory_space<vmem>>, vector<2x256xf32>
    %c0_1 = arith.constant 0 : index
    %c0_2 = arith.constant 0 : index
    %1 = vector.load %arg3[%c0_1, %c0_2] : memref<1x256xf32, #tpu.memory_space<vmem>>, vector<1x256xf32>
    %2 = vector.broadcast %1 : vector<1x256xf32> to vector<2x256xf32>
    %3 = arith.addf %0, %2 : vector<2x256xf32>
    %c0_3 = arith.constant 0 : index
    %c0_4 = arith.constant 0 : index
    %4 = vector.load %arg4[%c0_3, %c0_4] : memref<2x256xf32, #tpu.memory_space<vmem>>, vector<2x256xf32>
    tpu.vector_store %arg4[%c0_3, %c0_4], %3 {strides = array<i32>} : memref<2x256xf32, #tpu.memory_space<vmem>>, vector<2x256xf32>,
    return
  }
  func.func @transform_0(%arg0: i32, %arg1: i32) -> (i32, i32) {
    %c0_i32 = arith.constant 0 : i32
    return %arg0, %arg1 : i32, i32
  }
  func.func @transform_1(%arg0: i32, %arg1: i32) -> (i32, i32) {
    %c0_i32 = arith.constant 0 : i32
    %c0_i32_0 = arith.constant 0 : i32
    return %c0_i32, %arg1 : i32, i32
  }
  func.func @transform_2(%arg0: i32, %arg1: i32) -> (i32, i32) {
    %c0_i32 = arith.constant 0 : i32
    return %arg0, %arg1 : i32, i32
  }
}

</mosaic_0001>

<bundles_post_ra>
// kernel: tpu_custom_call.1
= control target key start
LH: loop header
LB: loop body
LE: loop exit
PB: predicated region body
PF: predicated region fallthrough
CT: control target
= control target key end

     0   :  { %7 = vsyncpa [#allocation3], 0  ;;  %s177_s0 = inlined_call_operand.hbm [shape: f32[2,256], index: 0, kind: input, shape index: {}]   ;;  %s178_s1 = inlined_call_operand.hbm [shape: f32[1,256], index: 1, kind: input, shape index: {}]   ;;  %s179_s2 = inlined_call_operand.hbm [shape: f32[2,256], index: 2, kind: output, shape index: {}]  }
   0x1   :  { %8 = vsyncpa [#allocation6], 0 }
   0x2   :  { %9 = vsyncpa [#allocation4], 0  ;;  %s15_s11 = sshll.u32 %s177_s0, 4  ;;  %s150_s12 = smov [#allocation2]   ;;  %s16_s11 = int_to_ptr.hbm [resolvable:$true] %s15_s11 }
   0x3   :  { %s17_s13 = sshll.u32 %s150_s12, 4  ;;  %s26_s16 = sshll.u32 %s178_s1, 4  ;;  %s18_s13 = int_to_ptr.vmem [resolvable:$true] %s17_s13  ;;  %s27_s16 = int_to_ptr.hbm [resolvable:$true] %s26_s16 }
   0x4   :  { %20 = dma.hbm_to_vmem [thread:$0]  %s16_s11, 64, %s18_s13, [#allocation3]  }
   0x5   :  { %s151_s17 = smov [#allocation5]  }
   0x6   :  { %s28_s18 = sshll.u32 %s151_s17, 4  ;;  %s29_s18 = int_to_ptr.vmem [resolvable:$true] %s28_s18 }
   0x7   :  { %31 = dma.hbm_to_vmem [thread:$0]  %s27_s16, 32, %s29_s18, [#allocation6]  }
   0x8   :  { %144 = dma.done.wait [#allocation3], 64  }
   0x9   :  { %145 = vsyncadd [#allocation3], 4294967232 }
   0xa   :  { %146 = dma.done.wait [#allocation6], 32  }
   0xb   :  { %147 = vsyncadd [#allocation6], 4294967264  ;;  %v41_v0 = vld [vmem:[#allocation5] sm:$0x3]  ;;  %vm46_vm0 = vcmask 1041408   ;;  %s152_s0 = smov [#allocation7]  }
   0xc   :  { %v43_v1 = vperm.slane %v41_v0, 0  ;;  %v44_v2 = vperm.slane %v41_v0, 1  ;;  %v40_v3 = vld [vmem:[#allocation2] sm:$0xf]  ;;  %s56_s19 = sshll.u32 %s152_s0, 4  ;;  %s58_s21 = sshll.u32 %s179_s2, 4  ;;  %s57_s19 = int_to_ptr.vmem [resolvable:$true] %s56_s19  ;;  %s59_s21 = int_to_ptr.hbm [resolvable:$true] %s58_s21 }
   0xe   :  { %v45_v4 = vrot.slane %v44_v2, 6 }
  0x10   :  { %v47_v5 = vsel %vm46_vm0, %v43_v1, %v45_v4 }
  0x11   :  { %v49_v6 = vadd.f32 %v47_v5, %v40_v3 }
  0x13   :  { %50 = vst [vmem:[#allocation7] sm:$0xf] %v49_v6 }
  0x14   :  { %61 = dma.vmem_to_hbm [thread:$0]  %s57_s19, 64, %s59_s21, [#allocation4]  }
  0x15   :  { %148 = dma.done.wait [#allocation4], 64  }
  0x16   :  { %149 = vsyncadd [#allocation4], 4294967232 }
  0x17   :  { %66 = vsyncpa [#allocation3], 1 }
  0x18   :  { %67 = vsyncpa [#allocation6], 1 }
  0x19   :  { %68 = vsyncpa [#allocation4], 1 }

</bundles_post_ra>
